<compile_context>
chip_gen: v7x
topology: tpu7x:2x2x1
jax: 0.10.0
libtpu: 0.0.40
codegen_flags: <defaults>
</compile_context>

<pallas_src>
import functools

import jax
import jax.numpy as jnp
from jax.experimental import pallas as pl
from jax.experimental.pallas import tpu as pltpu

E = 2        # num_excitations (ModuleList shares a single module across them)


def _osme_kernel(x_ref, w1t_ref, s1_ref, b1_ref, w2t_ref, s2_ref, b2_ref,
                 o_ref, *, inv_hw):
    # x_ref block: (nb, C, HW); weights are full (tiny) arrays; out block matches x.
    xb = x_ref[...]                                              # input dtype

    # Global average pool with f32 accumulation — no full-block f32 copy.
    pooled = jnp.sum(xb, axis=2, dtype=jnp.float32) * inv_hw     # (nb, C)

    # Shared excitation (weights identical across the ModuleList):
    # fc1 (1x1 conv, no bias) + folded bn1 + relu
    y1 = jnp.dot(pooled, w1t_ref[...], preferred_element_type=jnp.float32)  # (nb, Cr)
    y1 = jnp.maximum(y1 * s1_ref[...] + b1_ref[...], 0.0)
    # fc2 (1x1 conv, no bias) + folded bn2 + sigmoid
    y2 = jnp.dot(y1, w2t_ref[...], preferred_element_type=jnp.float32)      # (nb, C)
    gate = jax.nn.sigmoid(y2 * s2_ref[...] + b2_ref[...])                   # (nb, C)

    # Gate * input, broadcast over the spatial (lane) axis, in the input dtype.
    # Single store — the E outputs are deduplicated in the wrapper.
    o_ref[...] = gate.astype(xb.dtype)[:, :, None] * xb


def _vmem_budget():
    """Generation-aware VMEM sizing: ~48 MiB usable on 64 MiB parts (v7x per-TC),
    ~96 MiB on 128 MiB parts (v5e/v6e).  Conservative fallback if the query fails."""
    try:
        cap = int(pltpu.get_tpu_info().vmem_capacity_bytes)
    except Exception:
        cap = 64 << 20
    limit = min((cap * 3) // 4, 100 << 20)           # scoped VMEM limit to request
    block_budget = max(4 << 20, limit - (4 << 20))   # headroom for params/temps
    return limit, block_budget


def _choose_block_batch(N, C, HW, itemsize, block_budget):
    """Samples per grid step: largest block that fits the VMEM budget, while
    targeting >= 4 grid steps when the batch allows it (2 per TensorCore on
    v7x; enough pipeline depth on 1-TC chips to overlap the read of step i+1
    with the writeback of step i)."""
    # Double-buffered (1 input + 1 deduped output) tile per sample, +50% slack
    # for in-body temporaries (f32 pooling convert, gate broadcast).
    per_sample = max(1, int(2 * 2 * C * HW * itemsize * 1.5))
    nb_vmem = max(1, block_budget // per_sample)
    nb_steps = max(1, pl.cdiv(N, 4))
    return max(1, min(nb_vmem, nb_steps, N))


def osme_block(x, w1t, s1, b1, w2t, s2, b2):
    """x: (N, C, H, W).  Params are the single shared excitation module:
       w1t: (C, Cr)  s1,b1: (1, Cr)  w2t: (Cr, C)  s2,b2: (1, C).
       Returns a list of E arrays of shape (N, C, H, W).  All E outputs alias
       the same array (shared-module semantics of the PyTorch ModuleList)."""
    N, C, H, W = x.shape
    HW = H * W
    Cr = w1t.shape[1]
    itemsize = jnp.dtype(x.dtype).itemsize

    # No lane padding / unpadding passes: block last dims == full array dims.
    x_flat = x.reshape(N, C, HW)

    vmem_limit, block_budget = _vmem_budget()
    nb = _choose_block_batch(N, C, HW, itemsize, block_budget)
    grid = (pl.cdiv(N, nb),)     # partial last block: reads padded, stores masked

    blk = pl.BlockSpec((nb, C, HW), lambda n: (n, 0, 0))

    def full2(shape):
        # Whole (tiny) parameter array, resident across all grid steps.
        return pl.BlockSpec(shape, lambda n: (0, 0))

    param_bytes = 4 * (2 * C * Cr + 2 * Cr + 2 * C)
    cost = pl.CostEstimate(
        flops=int(2 * N * C * HW + 4 * N * C * Cr),      # pool + gate mul + 2 matmuls
        transcendentals=int(N * C),                      # sigmoid
        bytes_accessed=int(2 * N * C * HW * itemsize + param_bytes),
    )

    out = pl.pallas_call(
        functools.partial(_osme_kernel, inv_hw=1.0 / HW),
        out_shape=jax.ShapeDtypeStruct((N, C, HW), x.dtype),   # single deduped output
        grid=grid,
        in_specs=[
            blk,                 # x, nb samples per step
            full2((C, Cr)),      # fc1 weight (pre-transposed)
            full2((1, Cr)),      # bn1 scale (folded), channels on lanes
            full2((1, Cr)),      # bn1 bias  (folded)
            full2((Cr, C)),      # fc2 weight (pre-transposed)
            full2((1, C)),       # bn2 scale (folded)
            full2((1, C)),       # bn2 bias  (folded)
        ],
        out_specs=blk,
        compiler_params=pltpu.CompilerParams(
            dimension_semantics=("parallel",),
            vmem_limit_bytes=vmem_limit,
        ),
        cost_estimate=cost,
    )(x_flat, w1t, s1, b1, w2t, s2, b2)

    out = out.reshape(N, C, H, W)
    # ModuleList holds ONE shared module -> all E excitation outputs are equal.
    return [out] * E


def init_params(key, in_channels, reduction=16):
    """Deterministic synthetic params for the single shared excitation module;
    BatchNorm (eval mode) folded into scale/bias."""
    Cr = in_channels // reduction
    ks = jax.random.split(key, 10)
    eps = 1e-5

    # Conv2d 1x1 weights (out, in, 1, 1) -> (out, in); pre-transpose for the kernel.
    w1 = jax.random.normal(ks[0], (Cr, in_channels), jnp.float32) * 0.1
    w2 = jax.random.normal(ks[1], (in_channels, Cr), jnp.float32) * 0.1

    # bn1 params / running stats (eval mode)
    g1 = 1.0 + 0.1 * jax.random.normal(ks[2], (Cr,), jnp.float32)
    be1 = 0.1 * jax.random.normal(ks[3], (Cr,), jnp.float32)
    rm1 = 0.1 * jax.random.normal(ks[4], (Cr,), jnp.float32)
    rv1 = jnp.abs(jax.random.normal(ks[5], (Cr,), jnp.float32)) + 0.5
    s1 = g1 / jnp.sqrt(rv1 + eps)
    b1 = be1 - rm1 * s1

    # bn2 params / running stats (eval mode)
    g2 = 1.0 + 0.1 * jax.random.normal(ks[6], (in_channels,), jnp.float32)
    be2 = 0.1 * jax.random.normal(ks[7], (in_channels,), jnp.float32)
    rm2 = 0.1 * jax.random.normal(ks[8], (in_channels,), jnp.float32)
    rv2 = jnp.abs(jax.random.normal(ks[9], (in_channels,), jnp.float32)) + 0.5
    s2 = g2 / jnp.sqrt(rv2 + eps)
    b2 = be2 - rm2 * s2

    return (w1.T,                 # (C, Cr)
            s1.reshape(1, Cr), b1.reshape(1, Cr),
            w2.T,                 # (Cr, C)
            s2.reshape(1, in_channels), b2.reshape(1, in_channels))


def reference(x, w1t, s1, b1, w2t, s2, b2):
    """Pure-JAX reference (NCHW), mirrors the PyTorch forward in eval mode.
    The gate is shared across excitations because the ModuleList holds a single
    shared module; independent per-excitation weights would need per-e gates."""
    pooled = x.astype(jnp.float32).mean(axis=(2, 3))          # (N, C)
    y1 = jnp.maximum(pooled @ w1t * s1 + b1, 0.0)             # (N, Cr)
    gate = jax.nn.sigmoid(y1 @ w2t * s2 + b2)                 # (N, C)
    out = (gate[:, :, None, None] * x.astype(jnp.float32)).astype(x.dtype)
    return [out for _ in range(E)]


if __name__ == "__main__":
    N, C, H, W = 2, 64, 16, 16  # reduction=16 -> Cr=4, HW=256
    key = jax.random.PRNGKey(0)
    kx, kp = jax.random.split(key)
    x = jax.random.normal(kx, (N, C, H, W), jnp.float32)
    params = init_params(kp, C, reduction=16)

    outs = osme_block(x, *params)
    outs = [jax.block_until_ready(o) for o in outs]

    refs = reference(x, *params)
    for o, r in zip(outs, refs):
        assert o.shape == (N, C, H, W)
        if not jnp.allclose(o, r, atol=1e-5, rtol=1e-5):
            raise AssertionError("Pallas output does not match reference")

    print("KERNEL_OK")
</pallas_src>

<mosaic_0001>
module attributes {stable_mosaic.version = 11 : i64} {
  func.func @_osme_kernel(%arg0: i32, %arg1: memref<1x64x256xf32, #tpu.memory_space<vmem>>, %arg2: memref<64x4xf32, #tpu.memory_space<vmem>>, %arg3: memref<1x4xf32, #tpu.memory_space<vmem>>, %arg4: memref<1x4xf32, #tpu.memory_space<vmem>>, %arg5: memref<4x64xf32, #tpu.memory_space<vmem>>, %arg6: memref<1x64xf32, #tpu.memory_space<vmem>>, %arg7: memref<1x64xf32, #tpu.memory_space<vmem>>, %arg8: memref<1x64x256xf32, #tpu.memory_space<vmem>>) attributes {dimension_semantics = [#tpu.dimension_semantics<parallel>], iteration_bounds = array<i64: 2>, scalar_prefetch = 0 : i64, scratch_operands = 0 : i64, tpu.core_type = #tpu.core_type<tc>, window_params = [{transform_indices = @transform_0, window_bounds = array<i64: 1, 64, 256>}, {pipeline_mode = #tpu.pipeline_mode<synchronous>, transform_indices = @transform_1, window_bounds = array<i64: 64, 4>}, {pipeline_mode = #tpu.pipeline_mode<synchronous>, transform_indices = @transform_2, window_bounds = array<i64: 1, 4>}, {pipeline_mode = #tpu.pipeline_mode<synchronous>, transform_indices = @transform_3, window_bounds = array<i64: 1, 4>}, {pipeline_mode = #tpu.pipeline_mode<synchronous>, transform_indices = @transform_4, window_bounds = array<i64: 4, 64>}, {pipeline_mode = #tpu.pipeline_mode<synchronous>, transform_indices = @transform_5, window_bounds = array<i64: 1, 64>}, {pipeline_mode = #tpu.pipeline_mode<synchronous>, transform_indices = @transform_6, window_bounds = array<i64: 1, 64>}, {transform_indices = @transform_7, window_bounds = array<i64: 1, 64, 256>}]} {
    %c0 = arith.constant 0 : index
    %c0_0 = arith.constant 0 : index
    %c0_1 = arith.constant 0 : index
    %0 = vector.load %arg1[%c0, %c0_0, %c0_1] : memref<1x64x256xf32, #tpu.memory_space<vmem>>, vector<1x64x256xf32>
    %cst = arith.constant dense<0.000000e+00> : vector<1x64xf32>
    %1 = vector.multi_reduction <add>, %0, %cst [2] : vector<1x64x256xf32> to vector<1x64xf32>
    %cst_2 = arith.constant 3.906250e-03 : f32
    %2 = vector.broadcast %cst_2 : f32 to vector<1x64xf32>
    %3 = arith.mulf %1, %2 : vector<1x64xf32>
    %c0_3 = arith.constant 0 : index
    %c0_4 = arith.constant 0 : index
    %4 = vector.load %arg2[%c0_3, %c0_4] : memref<64x4xf32, #tpu.memory_space<vmem>>, vector<64x4xf32>
    %cst_5 = arith.constant dense<0.000000e+00> : vector<1x4xf32>
    %5 = tpu.matmul %3, %4, %cst_5 {dimension_numbers = #tpu.dot_dimension_numbers<[1], [0], [0], [1], [0, 0, 1, 1], [], []>} : vector<1x64xf32>, vector<64x4xf32>, vector<1x4xf32> -> vector<1x4xf32>
    %c0_6 = arith.constant 0 : index
    %c0_7 = arith.constant 0 : index
    %6 = vector.load %arg3[%c0_6, %c0_7] : memref<1x4xf32, #tpu.memory_space<vmem>>, vector<1x4xf32>
    %7 = arith.mulf %5, %6 : vector<1x4xf32>
    %c0_8 = arith.constant 0 : index
    %c0_9 = arith.constant 0 : index
    %8 = vector.load %arg4[%c0_8, %c0_9] : memref<1x4xf32, #tpu.memory_space<vmem>>, vector<1x4xf32>
    %9 = arith.addf %7, %8 : vector<1x4xf32>
    %cst_10 = arith.constant 0.000000e+00 : f32
    %10 = vector.broadcast %cst_10 : f32 to vector<1x4xf32>
    %11 = arith.maximumf %9, %10 : vector<1x4xf32>
    %c0_11 = arith.constant 0 : index
    %c0_12 = arith.constant 0 : index
    %12 = vector.load %arg5[%c0_11, %c0_12] : memref<4x64xf32, #tpu.memory_space<vmem>>, vector<4x64xf32>
    %cst_13 = arith.constant dense<0.000000e+00> : vector<1x64xf32>
    %13 = tpu.matmul %11, %12, %cst_13 {dimension_numbers = #tpu.dot_dimension_numbers<[1], [0], [0], [1], [0, 0, 1, 1], [], []>} : vector<1x4xf32>, vector<4x64xf32>, vector<1x64xf32> -> vector<1x64xf32>
    %c0_14 = arith.constant 0 : index
    %c0_15 = arith.constant 0 : index
    %14 = vector.load %arg6[%c0_14, %c0_15] : memref<1x64xf32, #tpu.memory_space<vmem>>, vector<1x64xf32>
    %15 = arith.mulf %13, %14 : vector<1x64xf32>
    %c0_16 = arith.constant 0 : index
    %c0_17 = arith.constant 0 : index
    %16 = vector.load %arg7[%c0_16, %c0_17] : memref<1x64xf32, #tpu.memory_space<vmem>>, vector<1x64xf32>
    %17 = arith.addf %15, %16 : vector<1x64xf32>
    %18 = arith.negf %17 : vector<1x64xf32>
    %19 = math.exp %18 : vector<1x64xf32>
    %cst_18 = arith.constant 1.000000e+00 : f32
    %20 = vector.broadcast %cst_18 : f32 to vector<1x64xf32>
    %21 = arith.addf %20, %19 : vector<1x64xf32>
    %22 = arith.divf %20, %21 : vector<1x64xf32>
    %23 = vector.shape_cast %22 : vector<1x64xf32> to vector<1x64x1xf32>
    %24 = vector.broadcast %23 : vector<1x64x1xf32> to vector<1x64x256xf32>
    %25 = arith.mulf %24, %0 : vector<1x64x256xf32>
    %c0_19 = arith.constant 0 : index
    %c0_20 = arith.constant 0 : index
    %c0_21 = arith.constant 0 : index
    %26 = vector.load %arg8[%c0_19, %c0_20, %c0_21] : memref<1x64x256xf32, #tpu.memory_space<vmem>>, vector<1x64x256xf32>
    tpu.vector_store %arg8[%c0_19, %c0_20, %c0_21], %25 {strides = array<i32>} : memref<1x64x256xf32, #tpu.memory_space<vmem>>, vector<1x64x256xf32>,
    return
  }
  func.func @transform_0(%arg0: i32) -> (i32, i32, i32) {
    %c0_i32 = arith.constant 0 : i32
    %c0_i32_0 = arith.constant 0 : i32
    %c0_i32_1 = arith.constant 0 : i32
    return %arg0, %c0_i32, %c0_i32_0 : i32, i32, i32
  }
  func.func @transform_1(%arg0: i32) -> (i32, i32) {
    %c0_i32 = arith.constant 0 : i32
    %c0_i32_0 = arith.constant 0 : i32
    %c0_i32_1 = arith.constant 0 : i32
    return %c0_i32, %c0_i32_0 : i32, i32
  }
  func.func @transform_2(%arg0: i32) -> (i32, i32) {
    %c0_i32 = arith.constant 0 : i32
    %c0_i32_0 = arith.constant 0 : i32
    %c0_i32_1 = arith.constant 0 : i32
    return %c0_i32, %c0_i32_0 : i32, i32
  }
  func.func @transform_3(%arg0: i32) -> (i32, i32) {
    %c0_i32 = arith.constant 0 : i32
    %c0_i32_0 = arith.constant 0 : i32
    %c0_i32_1 = arith.constant 0 : i32
    return %c0_i32, %c0_i32_0 : i32, i32
  }
  func.func @transform_4(%arg0: i32) -> (i32, i32) {
    %c0_i32 = arith.constant 0 : i32
    %c0_i32_0 = arith.constant 0 : i32
    %c0_i32_1 = arith.constant 0 : i32
    return %c0_i32, %c0_i32_0 : i32, i32
  }
  func.func @transform_5(%arg0: i32) -> (i32, i32) {
    %c0_i32 = arith.constant 0 : i32
    %c0_i32_0 = arith.constant 0 : i32
    %c0_i32_1 = arith.constant 0 : i32
    return %c0_i32, %c0_i32_0 : i32, i32
  }
  func.func @transform_6(%arg0: i32) -> (i32, i32) {
    %c0_i32 = arith.constant 0 : i32
    %c0_i32_0 = arith.constant 0 : i32
    %c0_i32_1 = arith.constant 0 : i32
    return %c0_i32, %c0_i32_0 : i32, i32
  }
  func.func @transform_7(%arg0: i32) -> (i32, i32, i32) {
    %c0_i32 = arith.constant 0 : i32
    %c0_i32_0 = arith.constant 0 : i32
    %c0_i32_1 = arith.constant 0 : i32
    return %arg0, %c0_i32, %c0_i32_0 : i32, i32, i32
  }
}

</mosaic_0001>

<bundles_post_ra>
// kernel: tpu_custom_call.1
= control target key start
LH: loop header
LB: loop body
LE: loop exit
PB: predicated region body
PF: predicated region fallthrough
CT: control target
= control target key end

     0   :  { %12 = vsyncpa [#allocation3], 0  ;;  %s1308_s0 = inlined_call_operand.hbm [shape: f32[2,64,256], index: 0, kind: input, shape index: {}]   ;;  %s1309_s1 = inlined_call_operand.vmem [shape: f32[64,4], index: 1, kind: input, shape index: {}]   ;;  %s1310_s2 = inlined_call_operand.vmem [shape: f32[1,4], index: 2, kind: input, shape index: {}]   ;;  %s1311_s3 = inlined_call_operand.vmem [shape: f32[1,4], index: 3, kind: input, shape index: {}]   ;;  %s1312_s4 = inlined_call_operand.vmem [shape: f32[4,64], index: 4, kind: input, shape index: {}]   ;;  %s1313_s5 = inlined_call_operand.vmem [shape: f32[1,64], index: 5, kind: input, shape index: {}]   ;;  %s1314_s6 = inlined_call_operand.vmem [shape: f32[1,64], index: 6, kind: input, shape index: {}]   ;;  %s1315_s7 = inlined_call_operand.hbm [shape: f32[2,64,256], index: 7, kind: output, shape index: {}]  }
   0x1   :  { %14 = vsyncpa [#allocation3 + $0x1], 0 }
   0x2   :  { %15 = vsyncpa [#allocation4], 0 }
   0x3   :  { %17 = vsyncpa [#allocation4 + $0x1], 0  ;;  %s1008_s24 = smov 0   ;;  %s1010_s25 = smov 0  }
   0x4   :  { %s1012_s26 = smov 0   ;;  %s1014_s27 = smov 0  }
   0x5 LB: > { %s1029_s28 = sadd.s32 4294967295, %s957_s27   ;;  %s737_s29 = sadd.s32 4294967294, %s957_s27   ;;  %s957_s27 = sphi %s1014_s27, %s1328_s27   ;;  %s953_s26 = sphi %s1012_s26, %s1327_s26   ;;  %s949_s25 = sphi %s1010_s25, %s1326_s25   ;;  %s945_s24 = sphi %s1008_s24, %s1325_s24  }
   0x6   : > { %s1033_s30 = sadd.s32 1, %s957_s27   ;;  %s30_s8 = sadd.s32 1, %s953_s26 }
   0x7   : > { %s27_s9 = ssub.s32 %s957_s27, %s1033_s30  ;;  %p37_p0 = scmp.ne.s32.totalorder %s953_s26, %s949_s25 }
   0x8   : > { %p28_p1 = scmp.eq.s32.totalorder %s27_s9, 0  ;;  %p38_p2 = scmp.eq.s32.totalorder %s957_s27, 0 }
   0x9   : > { %p43_p3 = scmp.ne.s32.totalorder %s949_s25, %s945_s24  ;;  %p44_p4 = scmp.eq.s32.totalorder %s1029_s28, 0 }
   0xa   : > { %s1045_s10 = scalar_select %p28_p1, %s953_s26, %s30_s8  }
   0xb   : > { %p1047_p5 = por %p38_p2, %p37_p0  ;;  %p1051_p6 = por %p44_p4, %p43_p3 }
   0xc   : > { %p193_p7 = scmp.eq.s32.totalorder %s1029_s28, 1  ;;  %p199_p8 = scmp.eq.s32.totalorder %s737_s29, 1 }
   0xd   : > { %p816_p10 = scmp.lt.s32.totalorder %s957_s27, 2  ;;  %s237_s15 = sand.u32 1, %s953_s26  }
   0xe   : > { %p1058_p11 = por %p193_p7, %p37_p0  ;;  %p1062_p12 = por %p199_p8, %p43_p3 }
   0xf   : > { %s755_s16 = sshll.u32 %s957_s27, 11  ;;  %s740_s17 = sshll.u32 %s237_s15, 7 }
  0x10   : > { %s1319_s13 = scalar_select %p1058_p11, 1, 0 }
  0x11   : > { %s1320_s14 = scalar_select %p1062_p12, 1, 0 }
  0x12   : > { %s1071_s20 = scalar_lea.hbm %s1308_s0, %s755_s16  ;;  %s241_s21 = scalar_lea.vmem [#allocation2], %s740_s17 }
  0x13   : > { %s248_s22 = sshll.u32 %s241_s21, 4  ;;  %p1075_p13 = pnand %p816_p10, %p1047_p5  ;;  %s1079_s22 = int_to_ptr.vmem [resolvable:$true] %s248_s22 }
  0x14   : > { %s1081_s29 = scalar_lea.sflag [#allocation3], %s237_s15  ;;  %s861_s8 = scalar_lea.hbm %s1071_s20, 2048 }
  0x15   : > { %p862_p0 = scmp.ne.s32.totalorder %s1071_s20, %s861_s8  ;;  %p863_p1 = pneg %p1075_p13 }
  0x16   : > { %s866_s16 = scalar_lea.hbm %s1308_s0, 4096  ;;  %p867_p4 = scmp.lt.u32.totalorder %s1071_s20, %s1308_s0 }
  0x17   : > { %p864_p2 = pnand %p863_p1, %p862_p0  ;;  %p868_p5 = scmp.lt.u32.totalorder %s866_s16, %s861_s8 }
  0x18   : > { %p870_p8 = scmp.lt.u32.totalorder %s861_s8, %s1071_s20 }
  0x19   : > { %p865_p3 = pneg %p864_p2  ;;  %p869_p7 = por %p868_p5, %p867_p4 }
  0x1b   : > { %p871_p10 = por %p870_p8, %p869_p7 }
  0x1d   : > { %p872_p9 = pnand %p871_p10, %p865_p3 }
  0x1f   : > { %875 = shalt.err (!%p872_p9)
}
  0x20   : > { %s876_s15 = scalar_lea.vmem %s1079_s22, 2048  ;;  %s959_s19 = smov [#allocation2]  }
  0x21   : > { %p877_p0 = scmp.ne.s32.totalorder %s1079_s22, %s876_s15  ;;  %s881_s21 = sshll.u32 %s959_s19, 4  ;;  %s882_s21 = int_to_ptr.vmem [resolvable:$false] %s881_s21 }
  0x22   : > { %s883_s9 = scalar_lea.vmem %s882_s21, 4096  ;;  %p884_p11 = scmp.lt.s32.totalorder %s1079_s22, %s882_s21 }
  0x23   : > { %p879_p2 = pnand %p877_p0, %p863_p1  ;;  %p885_p4 = scmp.lt.s32.totalorder %s883_s9, %s876_s15 }
  0x25   : > { %p880_p12 = pneg %p879_p2  ;;  %p886_p5 = por %p885_p4, %p884_p11 }
  0x27   : > { %p887_p7 = pnand %p886_p5, %p880_p12 }
  0x29   : > { %890 = shalt.err (!%p887_p7)
}
  0x2a   : > { %s960_s8 = smov 256   ;;  %s961_s11 = smov 16  }
  0x2b   : > { %811 = dma.hbm_to_vmem [thread:$0]  (!%p1075_p13), %s1071_s20, 2048, %s1079_s22, %s1081_s29, %s960_s8, %s960_s8, %s961_s11  }
  0x2c   : > { %p743_p9 = scmp.ge.s32.totalorder %s957_s27, 1  ;;  %p256_p1 = scmp.lt.s32.totalorder %s957_s27, 3 }
  0x2e   : > { %p257_p3 = pnand %p743_p9, %p256_p1 }
  0x2f   : > { %s1112_s16 = sand.u32 (!%p257_p3), 1, %s949_s25  }
  0x30   : > { %260 = sbr.rel (%p257_p3) target bundleno = 829 (0x33d), region = 48  ;;  %s744_s17 = sshll.u32 (!%p257_p3), %s1112_s16, 7 }
  0x31   : > { %s263_s18 = scalar_lea.sflag (!%p257_p3), [#allocation3], %s1112_s16  ;;  %s266_s15 = scalar_lea.vmem (!%p257_p3), [#allocation2], %s744_s17 }
  0x37   : > { %936 = dma.done.wait (%p1051_p6), %s263_s18, 2048  }
  0x38   : > { %938 = vsyncadd (%p1051_p6), %s263_s18, 4294965248  ;;  %v1122_v0 = vld [vmem:[%s266_s15] sm:$0xff]  ;;  %v1124_v1 = vld [vmem:[%s266_s15 + $0x8] sm:$0xff]  ;;  %v962_v27 = vmov 0.0|0.0   ;;  %vm963_vm0 = vmmov 0   ;;  %v964_v37 = vmov 0.0   ;;  %v361_v38 = vlaneseq }
  0x39   : > { %v1126_v2 = vld [vmem:[%s266_s15 + $0x20] sm:$0xff]  ;;  %v313_v3 = vadd.f32 %v1124_v1, %v1122_v0  ;;  %v1130_v4 = vld [vmem:[%s266_s15 + $0x28] sm:$0xff]  ;;  %v1132_v5 = vld [vmem:[%s266_s15 + $0x10] sm:$0xff]  ;;  %792 = vmatprep.subr.bf16.mxu0 %v962_v27  ;;  %784 = vmatprep.mubr.msk.f32.mxu0 %vm963_vm0, %v964_v37  ;;  %vm372_vm1 = vcmask 130112   ;;  %vm379_vm2 = vcmask 195712   ;;  %vm386_vm3 = vcmask 261312  }
  0x3a   : > { %v1134_v6 = vld [vmem:[%s266_s15 + $0x18] sm:$0xff]  ;;  %v319_v7 = vadd.f32 %v1130_v4, %v1126_v2  ;;  %v1138_v8 = vld [vmem:[%s266_s15 + $0x30] sm:$0xff]  ;;  %v1146_v12 = vld [vmem:[%s266_s15 + $0x40] sm:$0xff]  ;;  %787 = vmatprep.subr.mxu1 %v964_v37  ;;  %789 = vmatprep.mubr.msk.f32.mxu1 %vm963_vm0, %v964_v37  ;;  %v362_v39 = vand.u32 127, %v361_v38  ;;  %v1194_v40 = vshrl.u32 %v361_v38, 7  ;;  %vm393_vm4 = vcmask 326912  }
  0x3b   : > { %v1140_v9 = vld [vmem:[%s266_s15 + $0x38] sm:$0xff]  ;;  %314 = vadd.xlane.f32.xlu0 %v313_v3  ;;  %v316_v10 = vadd.f32 %v1134_v6, %v1132_v5  ;;  %v1148_v13 = vld [vmem:[%s266_s15 + $0x48] sm:$0xff]  ;;  %v1150_v14 = vld [vmem:[%s266_s15 + $0x50] sm:$0xff]  ;;  %vm400_vm5 = vcmask 392512   ;;  %vm407_vm6 = vcmask 458112   ;;  %vm414_vm7 = vcmask 523712  }
  0x3c   : > { %320 = vadd.xlane.f32.xlu1 %v319_v7  ;;  %v322_v11 = vadd.f32 %v1140_v9, %v1138_v8  ;;  %v1152_v15 = vld [vmem:[%s266_s15 + $0x58] sm:$0xff]  ;;  %v325_v16 = vadd.f32 %v1148_v13, %v1146_v12  ;;  %v1158_v18 = vld [vmem:[%s266_s15 + $0x60] sm:$0xff]  ;;  %v1160_v19 = vld [vmem:[%s266_s15 + $0x68] sm:$0xff]  ;;  %v367_v41 = vadd.s32 4294967288, %v362_v39  ;;  %v374_v43 = vadd.s32 4294967280, %v362_v39  ;;  %s1227_s22 = scalar_lea.vmem [#allocation5], %s744_s17 }
  0x3d   : > { %v328_v17 = vadd.f32 %v1152_v15, %v1150_v14  ;;  %v1162_v20 = vld [vmem:[%s266_s15 + $0x70] sm:$0xff]  ;;  %v1164_v21 = vld [vmem:[%s266_s15 + $0x78] sm:$0xff]  ;;  %v331_v22 = vadd.f32 %v1160_v19, %v1158_v18  ;;  %v345_v24 = vld [vmem:[%s1309_s1] sm:$0xff]  ;;  %v381_v44 = vadd.s32 4294967272, %v362_v39  ;;  %v365_v46 = vsub.s32 %v362_v39, %v1194_v40  ;;  %s756_s17 = sshll.u32 %s1029_s28, 11  ;;  %s664_s23 = sshll.u32 %s1227_s22, 4  ;;  %s1260_s23 = int_to_ptr.vmem [resolvable:$true] %s664_s23 }
  0x3e   : > { %v334_v23 = vadd.f32 %v1164_v21, %v1162_v20  ;;  %v346_v25 = vld [vmem:[%s1309_s1 + $0x8] sm:$0xff]  ;;  %v347_v28 = vld [vmem:[%s1309_s1 + $0x10] sm:$0xff]  ;;  %v348_v29 = vld [vmem:[%s1309_s1 + $0x18] sm:$0xff]  ;;  %v370_v48 = vsub.s32 %v367_v41, %v1194_v40  ;;  %v388_v49 = vadd.s32 4294967264, %v362_v39  ;;  %v377_v50 = vsub.s32 %v374_v43, %v1194_v40  ;;  %s1258_s21 = scalar_lea.hbm %s1315_s7, %s756_s17  ;;  %s651_s28 = scalar_lea.sflag [#allocation4], %s1112_s16 }
  0x3f   : > { %317 = vadd.xlane.f32.xlu0 %v316_v10  ;;  %v793_v26 = vpack.c.bf16 %v346_v25, %v345_v24  ;;  %v796_v30 = vpack.c.bf16 %v348_v29, %v347_v28  ;;  %v349_v31 = vld [vmem:[%s1309_s1 + $0x20] sm:$0xff]  ;;  %v350_v32 = vld [vmem:[%s1309_s1 + $0x28] sm:$0xff]  ;;  %v351_v34 = vld [vmem:[%s1309_s1 + $0x30] sm:$0xff]  ;;  %v384_v53 = vsub.s32 %v381_v44, %v1194_v40  ;;  %v395_v54 = vadd.s32 4294967256, %v362_v39  ;;  %s891_s9 = scalar_lea.vmem %s1260_s23, 2048  ;;  %p1322_p11 = scmp.ne.s32.totalorder %s1319_s13, 0 }
  0x40   : > { %323 = vadd.xlane.f32.xlu1 %v322_v11  ;;  %v799_v33 = vpack.c.bf16 %v350_v32, %v349_v31  ;;  %v352_v35 = vld [vmem:[%s1309_s1 + $0x38] sm:$0xff]  ;;  %v391_v60 = vsub.s32 %v388_v49, %v1194_v40  ;;  %v402_v61 = vadd.s32 4294967248, %v362_v39  ;;  %v409_v10 = vadd.s32 4294967240, %v362_v39  ;;  %v494_v39 = vld [vmem:[%s1312_s4] sm:$0xf]  ;;  %p892_p6 = scmp.ne.s32.totalorder %s1260_s23, %s891_s9  ;;  %s965_s8 = smov [#allocation5]  }
  0x41   : > { %794 = vmatpush3.bf16.msra.mxu0 %v793_v26  ;;  %v802_v36 = vpack.c.bf16 %v352_v35, %v351_v34  ;;  %v398_v7 = vsub.s32 %v395_v54, %v1194_v40  ;;  %vm416_vm8 = vcmask 523264   ;;  %vm499_vm9 = vcmask 1043456   ;;  %v489_v41 = vld [vmem:[%s1310_s2] sm:$0x1]  ;;  %s895_s11 = sshll.u32 %s965_s8, 4  ;;  %s896_s11 = int_to_ptr.vmem [resolvable:$false] %s895_s11 }
  0x42   : > { %795 = vmatprep.subr.bf16.mxu0 %v962_v27  ;;  %v405_v26 = vsub.s32 %v402_v61, %v1194_v40  ;;  %v412_v29 = vsub.s32 %v409_v10, %v1194_v40  ;;  %788 = vmatpush3.msk.msra.mxu1 %vm499_vm9, %v494_v39  ;;  %v491_v43 = vld [vmem:[%s1311_s3] sm:$0x1]  ;;  %vm495_vm10 = vcmask 31744   ;;  %p893_p12 = pnand %p892_p6, %p1322_p11  ;;  %s897_s18 = scalar_lea.vmem %s896_s11, 4096 }
  0x43   : > { %326 = vadd.xlane.f32.xlu0 %v325_v16  ;;  %p898_p8 = scmp.lt.s32.totalorder %s1260_s23, %s896_s11  ;;  %p899_p10 = scmp.lt.s32.totalorder %s897_s18, %s891_s9 }
  0x44   : > { %329 = vadd.xlane.f32.xlu1 %v328_v17  ;;  %p894_p13 = pneg %p893_p12 }
  0x45   : > { %797 = vmatpush3.bf16.msra.mxu0 %v796_v30  ;;  %p900_p0 = por %p899_p10, %p898_p8 }
  0x46   : > { %798 = vmatprep.subr.bf16.mxu0 %v962_v27 }
  0x47   : > { %332 = vadd.xlane.f32.xlu0 %v331_v22  ;;  %p901_p2 = pnand %p900_p0, %p894_p13 }
  0x48   : > { %335 = vadd.xlane.f32.xlu1 %v334_v23 }
  0x49   : > { %800 = vmatpush3.bf16.msra.mxu0 %v799_v33 }
  0x4a   : > { %801 = vmatprep.subr.bf16.mxu0 %v962_v27 }
  0x4d   : > { %803 = vmatpush3.bf16.msra.mxu0 %v802_v36 }
  0xc8   : > { %v315_v42 = vpop.xlane.xlu0 %314 }
  0xc9   : > { %v321_v45 = vpop.xlane.xlu1 %320  ;;  %v337_v47 = vmul.f32 0.00390625, %v315_v42 }
  0xca   : > { %v339_v51 = vmul.f32 0.00390625, %v321_v45 }
  0xcb   : > { %v366_v58 = vrot.slane %v337_v47, %v365_v46 }
  0xcc   : > { %v318_v52 = vpop.xlane.xlu0 %317  ;;  %v378_v62 = vrot.slane %v339_v51, %v377_v50  ;;  %v575_v50 = vld [vmem:[%s1314_s6] sm:$0x1] }
  0xcd   : > { %v338_v55 = vmul.f32 0.00390625, %v318_v52  ;;  %v324_v56 = vpop.xlane.xlu1 %323 }
  0xce   : > { %v340_v57 = vmul.f32 0.00390625, %v324_v56 }
  0xcf   : > { %v371_v59 = vrot.slane %v338_v55, %v370_v48  ;;  %v573_v48 = vld [vmem:[%s1313_s5] sm:$0x1] }
  0xd0   : > { %v385_v63 = vrot.slane %v340_v57, %v384_v53  ;;  %v327_v3 = vpop.xlane.xlu0 %326  ;;  %v585_v57 = vsub.s32 0, %v1194_v40 }
  0xd1   : > { %v373_v11 = vsel %vm372_vm1, %v371_v59, %v366_v58  ;;  %v341_v16 = vmul.f32 0.00390625, %v327_v3  ;;  %v330_v17 = vpop.xlane.xlu1 %329 }
  0xd2   : > { %v380_v22 = vsel %vm379_vm2, %v378_v62, %v373_v11  ;;  %v342_v23 = vmul.f32 0.00390625, %v330_v17 }
  0xd3   : > { %v387_v24 = vsel %vm386_vm3, %v385_v63, %v380_v22  ;;  %v392_v25 = vrot.slane %v341_v16, %v391_v60 }
  0xd4   : > { %v399_v27 = vrot.slane %v342_v23, %v398_v7  ;;  %v333_v28 = vpop.xlane.xlu0 %332 }
  0xd5   : > { %v394_v30 = vsel %vm393_vm4, %v392_v25, %v387_v24  ;;  %v343_v31 = vmul.f32 0.00390625, %v333_v28  ;;  %v336_v32 = vpop.xlane.xlu1 %335 }
  0xd6   : > { %v344_v33 = vmul.f32 0.00390625, %v336_v32  ;;  %v401_v35 = vsel %vm400_vm5, %v399_v27, %v394_v30 }
  0xd7   : > { %v406_v34 = vrot.slane %v343_v31, %v405_v26 }
  0xd8   : > { %v413_v36 = vrot.slane %v344_v33, %v412_v29 }
  0xd9   : > { %v408_v37 = vsel %vm407_vm6, %v406_v34, %v401_v35 }
  0xda   : > { %v415_v38 = vsel %vm414_vm7, %v413_v36, %v408_v37 }
  0xdb   : > { %785 = vmatmul.mubr.msk.f32.vlgmr.msra.gmra.mrb[0].mxu0 %vm416_vm8, %v415_v38 }
 0x1ae   : > { %v485_v42 = vpop.f32.mrb[0].mxu0 }
 0x1af   : > { %v490_v44 = vmul.f32 %v489_v41, %v485_v42  ;;  %v786_v45 = vpop.f32.mrb[1].mxu0 }
 0x1b1   : > { %v492_v46 = vadd.f32 %v491_v43, %v490_v44 }
 0x1b3   : > { %v493_v47 = vmax.f32 %v492_v46, 0.0 }
 0x1b5   : > { %790 = vmatmul.mubr.msk.f32.vlgmr.msra.gmra.mrb[0].mxu1 %vm495_vm10, %v493_v47 }
 0x288   : > { %v569_v49 = vpop.f32.mrb[0].mxu1 }
 0x289   : > { %v574_v51 = vmul.f32 %v573_v48, %v569_v49  ;;  %v791_v52 = vpop.f32.mrb[1].mxu1 }
 0x28b   : > { %v576_v53 = vadd.f32 %v575_v50, %v574_v51 }
 0x28d   : > { %v749_v54 = vmul.f32 -1.442695, %v576_v53 }
 0x28f   : > { %857 = vpow2.f32 %v749_v54 }
 0x299   : > { %v858_v55 = vpop.eup %857 }
 0x29a   : > { %v580_v56 = vadd.f32 1.0, %v858_v55 }
 0x29c   : > { %859 = vrcp.f32 %v580_v56 }
 0x2a6   : > { %v860_v58 = vpop.eup %859 }
 0x2a7   : > { %v586_v59 = vrot.slane %v860_v58, %v585_v57 }
 0x2a9   : > { %592 = vbcast.lane.b32.xlu1 %v586_v59, 264  ;;  %588 = vbcast.lane.b32.xlu0 %v586_v59, 256 }
 0x2ad   : > { %596 = vbcast.lane.b32.xlu1 %v586_v59, 272  ;;  %604 = vbcast.lane.b32.xlu0 %v586_v59, 288 }
 0x2b1   : > { %600 = vbcast.lane.b32.xlu1 %v586_v59, 280  ;;  %612 = vbcast.lane.b32.xlu0 %v586_v59, 304 }
 0x2b5   : > { %608 = vbcast.lane.b32.xlu1 %v586_v59, 296 }
 0x2b9   : > { %616 = vbcast.lane.b32.xlu1 %v586_v59, 312 }
 0x31b   : > { %v593_v60 = vpop.permute.xlu1 %592  ;;  %v589_v61 = vpop.permute.xlu0 %588 }
 0x31c   : > { %v620_v62 = vmul.f32 %v593_v60, %v1132_v5  ;;  %v621_v63 = vmul.f32 %v593_v60, %v1134_v6  ;;  %v618_v3 = vmul.f32 %v589_v61, %v1122_v0  ;;  %v619_v40 = vmul.f32 %v589_v61, %v1124_v1 }
 0x31e   : > { %636 = vst [vmem:[%s1227_s22 + $0x10] sm:$0xff] %v620_v62  ;;  %637 = vst [vmem:[%s1227_s22 + $0x18] sm:$0xff] %v621_v63 }
 0x31f   : > { %634 = vst [vmem:[%s1227_s22] sm:$0xff] %v618_v3  ;;  %635 = vst [vmem:[%s1227_s22 + $0x8] sm:$0xff] %v619_v40  ;;  %v597_v5 = vpop.permute.xlu1 %596  ;;  %v605_v0 = vpop.permute.xlu0 %604 }
 0x320   : > { %v622_v1 = vmul.f32 %v597_v5, %v1126_v2  ;;  %v623_v6 = vmul.f32 %v597_v5, %v1130_v4  ;;  %v626_v7 = vmul.f32 %v605_v0, %v1146_v12  ;;  %v627_v10 = vmul.f32 %v605_v0, %v1148_v13 }
 0x322   : > { %638 = vst [vmem:[%s1227_s22 + $0x20] sm:$0xff] %v622_v1  ;;  %639 = vst [vmem:[%s1227_s22 + $0x28] sm:$0xff] %v623_v6 }
 0x323   : > { %642 = vst [vmem:[%s1227_s22 + $0x40] sm:$0xff] %v626_v7  ;;  %643 = vst [vmem:[%s1227_s22 + $0x48] sm:$0xff] %v627_v10  ;;  %v601_v11 = vpop.permute.xlu1 %600  ;;  %v613_v16 = vpop.permute.xlu0 %612 }
 0x324   : > { %v624_v2 = vmul.f32 %v601_v11, %v1138_v8  ;;  %v625_v17 = vmul.f32 %v601_v11, %v1140_v9  ;;  %v630_v4 = vmul.f32 %v613_v16, %v1158_v18  ;;  %v631_v12 = vmul.f32 %v613_v16, %v1160_v19 }
 0x326   : > { %640 = vst [vmem:[%s1227_s22 + $0x30] sm:$0xff] %v624_v2  ;;  %641 = vst [vmem:[%s1227_s22 + $0x38] sm:$0xff] %v625_v17 }
 0x327   : > { %646 = vst [vmem:[%s1227_s22 + $0x60] sm:$0xff] %v630_v4  ;;  %647 = vst [vmem:[%s1227_s22 + $0x68] sm:$0xff] %v631_v12  ;;  %v609_v13 = vpop.permute.xlu1 %608 }
 0x328   : > { %v628_v22 = vmul.f32 %v609_v13, %v1150_v14  ;;  %v629_v23 = vmul.f32 %v609_v13, %v1152_v15 }
 0x32a   : > { %644 = vst [vmem:[%s1227_s22 + $0x50] sm:$0xff] %v628_v22  ;;  %645 = vst [vmem:[%s1227_s22 + $0x58] sm:$0xff] %v629_v23 }
 0x32b   : > { %v617_v8 = vpop.permute.xlu1 %616 }
 0x32c   : > { %v632_v9 = vmul.f32 %v617_v8, %v1162_v20  ;;  %v633_v14 = vmul.f32 %v617_v8, %v1164_v21 }
 0x32e   : > { %648 = vst [vmem:[%s1227_s22 + $0x70] sm:$0xff] %v632_v9  ;;  %649 = vst [vmem:[%s1227_s22 + $0x78] sm:$0xff] %v633_v14 }
 0x32f   : > { %904 = shalt.err (!%p901_p2)
}
 0x330   : > { %s905_s15 = scalar_lea.hbm %s1258_s21, 2048  ;;  %s909_s22 = scalar_lea.hbm %s1315_s7, 4096 }
 0x331   : > { %p906_p4 = scmp.ne.s32.totalorder %s1258_s21, %s905_s15  ;;  %p910_p9 = scmp.lt.u32.totalorder %s1258_s21, %s1315_s7 }
 0x332   : > { %p911_p1 = scmp.lt.u32.totalorder %s909_s22, %s905_s15  ;;  %p913_p6 = scmp.lt.u32.totalorder %s905_s15, %s1258_s21 }
 0x333   : > { %p907_p5 = pnand %p906_p4, %p1322_p11 }
 0x334   : > { %p912_p3 = por %p911_p1, %p910_p9 }
 0x335   : > { %p908_p7 = pneg %p907_p5 }
 0x336   : > { %p914_p12 = por %p913_p6, %p912_p3 }
 0x338   : > { %p915_p13 = pnand %p914_p12, %p908_p7 }
 0x33a   : > { %918 = shalt.err (!%p915_p13)
}
 0x33b   : > { %s966_s19 = smov 256   ;;  %s967_s9 = smov 16  }
 0x33c   : > { %806 = dma.vmem_to_hbm [thread:$0]  (%p1322_p11), %s1260_s23, 2048, %s1258_s21, %s651_s28, %s966_s19, %s966_s19, %s967_s9  }
 0x33d PF: > { %s679_s8 = sand.u32 1, %s945_s24   ;;  %p1323_p8 = scmp.ne.s32.totalorder %s1320_s14, 0 }
 0x33e   : > { %p1324_p10 = scmp.ge.s32.totalorder %s957_s27, 2  ;;  %s680_s11 = scalar_lea.sflag [#allocation4], %s679_s8 }
 0x340   : > { %p813_p0 = pnand %p1324_p10, %p1323_p8 }
 0x342   : > { %940 = dma.done.wait (!%p813_p0), %s680_s11, 2048  }
 0x343   : > { %942 = vsyncadd (!%p813_p0), %s680_s11, 4294965248  ;;  %p20_p2 = scmp.ge.s32.totalorder %s1033_s30, 4   ;;  %s1325_s24 = smov %s949_s25 }
 0x344   : > { %s1326_s25 = smov %s953_s26  ;;  %s1327_s26 = smov %s1045_s10 }
 0x345   : > { %s1328_s27 = smov %s1033_s30  ;;  %22 = sbr.rel (!%p20_p2) target bundleno = 5 (0x5), region = 93 }
 0x34c   :  { %685 = vsyncpa [#allocation3], 1 }
 0x34d   :  { %687 = vsyncpa [#allocation3 + $0x1], 1 }
 0x34e   :  { %688 = vsyncpa [#allocation4], 1 }
 0x34f   :  { %690 = vsyncpa [#allocation4 + $0x1], 1 }

</bundles_post_ra>
